<compile_context>
chip_gen: v6e
topology: v6e:2x2x1
jax: 0.10.0
libtpu: 0.0.40
codegen_flags: <defaults>
</compile_context>

<pallas_src>
import math
import functools

import jax
import jax.numpy as jnp
from jax import lax
from jax.experimental import pallas as pl
from jax.experimental.pallas import tpu as pltpu


def _round_up(x, m):
    return (x + m - 1) // m * m


def _wing_loss_kernel(pred_ref, gt_ref, out_ref, acc_ref, *, w, inv_eps, const,
                      acc_rows, num_partials, mask_last_block, valid_rows_last):
    """Elementwise wing loss with a resident (acc_rows, 128) accumulator.

    Grid = (num_partials, blocks_per_partial). The inner axis is a reduction
    ("arbitrary"); the leading axis is "parallel" so v7x's two TensorCores can
    each own an independent partial sum. All constants (w, 1/eps, the wing
    constant, tail-row count) are baked in at trace time, so there are no SMEM
    scalar inputs and the per-element divide becomes a multiply.
    """
    i = pl.program_id(0)
    j = pl.program_id(1)
    nj = pl.num_programs(1)

    @pl.when(j == 0)
    def _():
        acc_ref[...] = jnp.zeros_like(acc_ref)

    diff = jnp.abs(pred_ref[...].astype(jnp.float32)
                   - gt_ref[...].astype(jnp.float32))
    loss = jnp.where(diff < w, w * jnp.log1p(diff * inv_eps), diff - const)

    if mask_last_block:
        # Only the globally-last block is partial; its out-of-range rows hold
        # unspecified VMEM data (possibly NaN/Inf), so mask with a select on
        # the final loss (never a multiply-mask).  Interior blocks skip this.
        is_last = jnp.logical_and(i == num_partials - 1, j == nj - 1)

        @pl.when(is_last)
        def _():
            row = lax.broadcasted_iota(jnp.int32, loss.shape, 0)
            masked = jnp.where(row < valid_rows_last, loss, 0.0)
            acc_ref[...] += masked.reshape(-1, acc_rows, 128).sum(axis=0)

        @pl.when(jnp.logical_not(is_last))
        def _():
            acc_ref[...] += loss.reshape(-1, acc_rows, 128).sum(axis=0)
    else:
        acc_ref[...] += loss.reshape(-1, acc_rows, 128).sum(axis=0)

    @pl.when(j == nj - 1)
    def _():
        # Single (cheap, once-per-partial) cross-lane reduce in the epilogue.
        out_ref[0, 0] = jnp.sum(acc_ref[...])


@functools.partial(jax.jit, static_argnames=("w", "epsilon"))
def wing_loss(prediction, gt, *, w=10.0, epsilon=2.0):
    assert prediction.shape == gt.shape
    n_elems = prediction.size
    assert n_elems > 0, "wing_loss of an empty tensor is undefined"
    constant = w - w * math.log(1.0 + w / epsilon)

    lanes = 128
    itemsize = jnp.dtype(prediction.dtype).itemsize
    # Packed-sublane row tile: 8 for f32, 16 for bf16, 32 for int8/fp8.
    row_tile = max(8, 8 * (4 // max(1, itemsize)))

    pred_flat = prediction.reshape(-1)
    gt_flat = gt.reshape(-1)
    lane_pad = (-n_elems) % lanes
    if lane_pad:
        # Only truly lane-ragged sizes (n_elems % 128 != 0) pay this copy;
        # padded entries have pred == gt == 0 -> wing loss contribution is 0.
        # Common NCHW sizes (multiples of 128) take the zero-copy path.
        pred_flat = jnp.pad(pred_flat, (0, lane_pad))
        gt_flat = jnp.pad(gt_flat, (0, lane_pad))
    rows = (n_elems + lane_pad) // lanes
    # No wrapper-side astype: the kernel casts to f32 in-VMEM, so HBM traffic
    # stays at the input dtype's width (bf16 inputs stay bf16 in HBM).
    pred2d = pred_flat.reshape(rows, lanes)
    gt2d = gt_flat.reshape(rows, lanes)

    # ~4 MiB per input block (8192 f32 rows): double-buffered footprint is
    # 2 inputs x 2 bufs x 4 MiB = 16 MiB, which fits everywhere with the
    # 32 MiB vmem limit set below (v7x has only 64 MiB physical VMEM).
    target_block_bytes = 4 << 20
    max_block_rows = max(
        row_tile,
        (target_block_bytes // (lanes * itemsize)) // row_tile * row_tile)
    block_rows = min(max_block_rows, _round_up(rows, row_tile))

    num_blocks = pl.cdiv(rows, block_rows)
    # Two independent partial sums (v7x megacore) only when the block count
    # divides evenly -- avoids fully out-of-range blocks and wasted work on
    # single-TC generations, where the leading axis is just a sequential loop.
    num_partials = 2 if (num_blocks % 2 == 0 and num_blocks >= 2) else 1
    blocks_per_partial = num_blocks // num_partials

    # Ragged tail handled in-kernel (no full-tensor pad): the last block may
    # extend past `rows`; those rows are masked with a static row count.
    mask_last_block = (rows % block_rows) != 0
    valid_rows_last = rows - (num_blocks - 1) * block_rows

    # Wide accumulator (up to 8 independent vregs) to break the serial vadd
    # chain; must divide block_rows.
    acc_rows = 8
    for cand in (64, 32, 16):
        if block_rows % cand == 0:
            acc_rows = cand
            break

    kernel = functools.partial(
        _wing_loss_kernel,
        w=float(w),
        inv_eps=float(1.0 / epsilon),
        const=float(constant),
        acc_rows=acc_rows,
        num_partials=num_partials,
        mask_last_block=mask_last_block,
        valid_rows_last=valid_rows_last,
    )

    partials = pl.pallas_call(
        kernel,
        out_shape=jax.ShapeDtypeStruct((num_partials, 1), jnp.float32),
        grid_spec=pltpu.PrefetchScalarGridSpec(
            num_scalar_prefetch=0,
            grid=(num_partials, blocks_per_partial),
            in_specs=[
                pl.BlockSpec((block_rows, lanes),
                             lambda i, j: (i * blocks_per_partial + j, 0)),
                pl.BlockSpec((block_rows, lanes),
                             lambda i, j: (i * blocks_per_partial + j, 0)),
            ],
            out_specs=pl.BlockSpec((1, 1), lambda i, j: (i, 0),
                                   memory_space=pltpu.SMEM),
            scratch_shapes=[pltpu.VMEM((acc_rows, lanes), jnp.float32)],
        ),
        compiler_params=pltpu.CompilerParams(
            dimension_semantics=("parallel", "arbitrary"),
            vmem_limit_bytes=32 << 20),
    )(pred2d, gt2d)

    return jnp.sum(partials) * jnp.float32(1.0 / n_elems)


def wing_loss_ref(prediction, gt, *, w=10.0, epsilon=2.0):
    constant = w - w * math.log(1.0 + w / epsilon)
    diff = jnp.abs(prediction.astype(jnp.float32) - gt.astype(jnp.float32))
    loss = jnp.where(diff < w, w * jnp.log1p(diff / epsilon), diff - constant)
    return jnp.mean(loss.reshape(-1))


if __name__ == "__main__":
    key = jax.random.PRNGKey(0)
    k1, k2 = jax.random.split(key)

    # landmark-regression style tensors, NCHW (B, C, H, W) -- small demo.
    pred = jax.random.normal(k1, (2, 4, 16, 16), dtype=jnp.float32) * 5.0
    gt = jax.random.normal(k2, (2, 4, 16, 16), dtype=jnp.float32) * 5.0
    out = jax.block_until_ready(wing_loss(pred, gt, w=10.0, epsilon=2.0))
    ref = wing_loss_ref(pred, gt, w=10.0, epsilon=2.0)
    assert jnp.allclose(out, ref, rtol=1e-4, atol=1e-4), (out, ref)

    # Lane-ragged size (n % 128 != 0): exercises the minimal-pad + masked
    # partial-block path.
    k3, k4 = jax.random.split(k1)
    pred_r = jax.random.normal(k3, (3, 7, 64, 65), dtype=jnp.float32) * 5.0
    gt_r = jax.random.normal(k4, (3, 7, 64, 65), dtype=jnp.float32) * 5.0
    out_r = jax.block_until_ready(wing_loss(pred_r, gt_r))
    ref_r = wing_loss_ref(pred_r, gt_r)
    assert jnp.allclose(out_r, ref_r, rtol=1e-4, atol=1e-4), (out_r, ref_r)

    # Multi-block path: 8200 rows -> 2 blocks, 2 partial sums, masked tail
    # block, zero wrapper-side padding.
    k5, k6 = jax.random.split(k2)
    pred_b = jax.random.normal(k5, (25, 41, 32, 32), dtype=jnp.float32) * 5.0
    gt_b = jax.random.normal(k6, (25, 41, 32, 32), dtype=jnp.float32) * 5.0
    out_b = jax.block_until_ready(wing_loss(pred_b, gt_b))
    ref_b = wing_loss_ref(pred_b, gt_b)
    assert jnp.allclose(out_b, ref_b, rtol=1e-4, atol=1e-4), (out_b, ref_b)

    print("KERNEL_OK")
</pallas_src>

<mosaic_0001>
module attributes {stable_mosaic.version = 11 : i64} {
  func.func @_wing_loss_kernel(%arg0: i32, %arg1: i32, %arg2: memref<16x128xf32, #tpu.memory_space<vmem>>, %arg3: memref<16x128xf32, #tpu.memory_space<vmem>>, %arg4: memref<1x1xf32, #tpu.memory_space<smem>>, %arg5: memref<16x128xf32, #tpu.memory_space<vmem>>) attributes {dimension_semantics = [#tpu.dimension_semantics<parallel>, #tpu.dimension_semantics<arbitrary>], iteration_bounds = array<i64: 1, 1>, scalar_prefetch = 0 : i64, scratch_operands = 1 : i64, tpu.core_type = #tpu.core_type<tc>, window_params = [{transform_indices = @transform_0, window_bounds = array<i64: 16, 128>}, {transform_indices = @transform_1, window_bounds = array<i64: 16, 128>}, {transform_indices = @transform_2, window_bounds = array<i64: 1, 1>}]} {
    %c0_i32 = arith.constant 0 : i32
    %0 = arith.cmpi eq, %arg1, %c0_i32 : i32
    %1 = arith.extui %0 : i1 to i32
    %c0_i32_0 = arith.constant 0 : i32
    %2 = arith.cmpi ne, %1, %c0_i32_0 : i32
    scf.if %2 {
      %cst_14 = arith.constant 0.000000e+00 : f32
      %25 = vector.broadcast %cst_14 : f32 to vector<16x128xf32>
      %c0_15 = arith.constant 0 : index
      %c0_16 = arith.constant 0 : index
      %26 = vector.load %arg5[%c0_15, %c0_16] : memref<16x128xf32, #tpu.memory_space<vmem>>, vector<16x128xf32>
      tpu.vector_store %arg5[%c0_15, %c0_16], %25 {strides = array<i32>} : memref<16x128xf32, #tpu.memory_space<vmem>>, vector<16x128xf32>,
    } else {
    }
    %c0 = arith.constant 0 : index
    %c0_1 = arith.constant 0 : index
    %3 = vector.load %arg2[%c0, %c0_1] : memref<16x128xf32, #tpu.memory_space<vmem>>, vector<16x128xf32>
    %c0_2 = arith.constant 0 : index
    %c0_3 = arith.constant 0 : index
    %4 = vector.load %arg3[%c0_2, %c0_3] : memref<16x128xf32, #tpu.memory_space<vmem>>, vector<16x128xf32>
    %5 = arith.subf %3, %4 : vector<16x128xf32>
    %6 = math.absf %5 : vector<16x128xf32>
    %cst = arith.constant 1.000000e+01 : f32
    %7 = vector.broadcast %cst : f32 to vector<16x128xf32>
    %8 = arith.cmpf olt, %6, %7 : vector<16x128xf32>
    %cst_4 = arith.constant 5.000000e-01 : f32
    %9 = vector.broadcast %cst_4 : f32 to vector<16x128xf32>
    %10 = arith.mulf %6, %9 : vector<16x128xf32>
    %11 = math.log1p %10 : vector<16x128xf32>
    %cst_5 = arith.constant 1.000000e+01 : f32
    %12 = vector.broadcast %cst_5 : f32 to vector<16x128xf32>
    %13 = arith.mulf %12, %11 : vector<16x128xf32>
    %cst_6 = arith.constant -7.9175949 : f32
    %14 = vector.broadcast %cst_6 : f32 to vector<16x128xf32>
    %15 = arith.subf %6, %14 : vector<16x128xf32>
    %16 = arith.select %8, %13, %15 : vector<16x128xi1>, vector<16x128xf32>
    %c0_7 = arith.constant 0 : index
    %c0_8 = arith.constant 0 : index
    %17 = vector.load %arg5[%c0_7, %c0_8] : memref<16x128xf32, #tpu.memory_space<vmem>>, vector<16x128xf32>
    %18 = vector.shape_cast %16 : vector<16x128xf32> to vector<1x16x128xf32>
    %cst_9 = arith.constant dense<0.000000e+00> : vector<16x128xf32>
    %19 = vector.multi_reduction <add>, %18, %cst_9 [0] : vector<1x16x128xf32> to vector<16x128xf32>
    %20 = arith.addf %17, %19 : vector<16x128xf32>
    %c0_10 = arith.constant 0 : index
    %c0_11 = arith.constant 0 : index
    %21 = vector.load %arg5[%c0_10, %c0_11] : memref<16x128xf32, #tpu.memory_space<vmem>>, vector<16x128xf32>
    tpu.vector_store %arg5[%c0_10, %c0_11], %20 {strides = array<i32>} : memref<16x128xf32, #tpu.memory_space<vmem>>, vector<16x128xf32>,
    %c0_i32_12 = arith.constant 0 : i32
    %22 = arith.cmpi eq, %arg1, %c0_i32_12 : i32
    %23 = arith.extui %22 : i1 to i32
    %c0_i32_13 = arith.constant 0 : i32
    %24 = arith.cmpi ne, %23, %c0_i32_13 : i32
    scf.if %24 {
      %c0_14 = arith.constant 0 : index
      %c0_15 = arith.constant 0 : index
      %25 = vector.load %arg5[%c0_14, %c0_15] : memref<16x128xf32, #tpu.memory_space<vmem>>, vector<16x128xf32>
      %26 = vector.shape_cast %25 : vector<16x128xf32> to vector<1x16x128xf32>
      %cst_16 = arith.constant dense<0.000000e+00> : vector<1xf32>
      %27 = vector.multi_reduction <add>, %26, %cst_16 [1, 2] : vector<1x16x128xf32> to vector<1xf32>
      %28 = vector.shape_cast %27 : vector<1xf32> to vector<1x1x1xf32>
      %29 = vector.extract %28[0, 0, 0] : f32 from vector<1x1x1xf32>
      %c0_17 = arith.constant 0 : index
      %c0_18 = arith.constant 0 : index
      %30 = memref.load %arg4[%c0_17, %c0_18] : memref<1x1xf32, #tpu.memory_space<smem>>
      memref.store %29, %arg4[%c0_17, %c0_18] : memref<1x1xf32, #tpu.memory_space<smem>>
    } else {
    }
    return
  }
  func.func @transform_0(%arg0: i32, %arg1: i32) -> (i32, i32) {
    %c1_i32 = arith.constant 1 : i32
    %0 = arith.muli %arg0, %c1_i32 : i32
    %1 = arith.addi %0, %arg1 : i32
    %c0_i32 = arith.constant 0 : i32
    %c0_i32_0 = arith.constant 0 : i32
    return %1, %c0_i32 : i32, i32
  }
  func.func @transform_1(%arg0: i32, %arg1: i32) -> (i32, i32) {
    %c1_i32 = arith.constant 1 : i32
    %0 = arith.muli %arg0, %c1_i32 : i32
    %1 = arith.addi %0, %arg1 : i32
    %c0_i32 = arith.constant 0 : i32
    %c0_i32_0 = arith.constant 0 : i32
    return %1, %c0_i32 : i32, i32
  }
  func.func @transform_2(%arg0: i32, %arg1: i32) -> (i32, i32) {
    %c0_i32 = arith.constant 0 : i32
    %c0_i32_0 = arith.constant 0 : i32
    return %arg0, %c0_i32 : i32, i32
  }
}

</mosaic_0001>

<bundles_post_ra>
// kernel: wing_loss.1
= control target key start
LH: loop header
LB: loop body
LE: loop exit
PB: predicated region body
PF: predicated region fallthrough
CT: control target
= control target key end

     0   :  { %s198_s0 = inlined_call_operand.vmem [shape: f32[16,128], index: 0, kind: input, shape index: {}]   ;;  %s199_s1 = inlined_call_operand.vmem [shape: f32[16,128], index: 1, kind: input, shape index: {}]   ;;  %s200_s2 = inlined_call_operand.hbm [shape: f32[1,1], index: 2, kind: output, shape index: {}]  }
   0x1   :  { %v62_v0 = vld [vmem:[%s198_s0] sm:$0xff]  ;;  %v63_v1 = vld [vmem:[%s198_s0 + $0x8] sm:$0xff] }
   0x2   :  { %v64_v2 = vld [vmem:[%s199_s1] sm:$0xff]  ;;  %v65_v3 = vld [vmem:[%s199_s1 + $0x8] sm:$0xff] }
   0x3   :  { %v66_v4 = vsub.f32 %v62_v0, %v64_v2 }
   0x4   :  { %7 = vsyncpa [#allocation4], 0  ;;  %v67_v5 = vsub.f32 %v63_v1, %v65_v3  ;;  %s167_s1 = smov [#allocation3]  }
   0x5   :  { %v68_v6 = vand.u32 2147483647, %v66_v4 }
   0x6   :  { %v69_v7 = vand.u32 2147483647, %v67_v5 }
   0x7   :  { %v72_v8 = vmul.f32 0.5, %v68_v6  ;;  %v148_v24 = vadd.f32 7.917595, %v68_v6  ;;  %vm70_vm2 = vcmp.lt.f32.partialorder %v68_v6, 10.0 }
   0x8   :  { %v73_v9 = vmul.f32 0.5, %v69_v7  ;;  %v149_v26 = vadd.f32 7.917595, %v69_v7  ;;  %vm71_vm3 = vcmp.lt.f32.partialorder %v69_v7, 10.0 }
   0x9   :  { %v74_v10 = vadd.f32 1.0, %v72_v8  ;;  %v77_v12 = vmul.f32 -0.5, %v72_v8  ;;  %v80_v15 = vand.u32 2147483647, %v72_v8 }
   0xa   :  { %v83_v11 = vadd.f32 1.0, %v73_v9  ;;  %v86_v13 = vmul.f32 -0.5, %v73_v9  ;;  %v89_v17 = vand.u32 2147483647, %v73_v9 }
   0xb   :  { %153 = vlog2.f32 %v74_v10  ;;  %v78_v14 = vadd.f32 1.0, %v77_v12  ;;  %vm81_vm0 = vcmp.lt.f32.partialorder %v80_v15, 0.0004427343 }
   0xc   :  { %155 = vlog2.f32 %v83_v11  ;;  %v87_v16 = vadd.f32 1.0, %v86_v13  ;;  %vm90_vm1 = vcmp.lt.f32.partialorder %v89_v17, 0.0004427343 }
   0xd   :  { %v79_v18 = vmul.f32 %v78_v14, %v72_v8 }
   0xe   :  { %v88_v20 = vmul.f32 %v87_v16, %v73_v9 }
  0x18   :  { %v154_v19 = vpop.eup %153 }
  0x19   :  { %v156_v21 = vpop.eup %155  ;;  %v76_v22 = vmul.f32 0.6931472, %v154_v19 }
  0x1a   :  { %v85_v23 = vmul.f32 0.6931472, %v156_v21 }
  0x1b   :  { %v82_v25 = vsel %vm81_vm0, %v79_v18, %v76_v22 }
  0x1c   :  { %v91_v27 = vsel %vm90_vm1, %v88_v20, %v85_v23  ;;  %v92_v28 = vmul.f32 10.0, %v82_v25 }
  0x1d   :  { %v93_v29 = vmul.f32 10.0, %v91_v27 }
  0x1e   :  { %v96_v30 = vsel %vm70_vm2, %v92_v28, %v148_v24 }
  0x1f   :  { %v97_v31 = vsel %vm71_vm3, %v93_v29, %v149_v26 }
  0x20   :  { %v111_v32 = vadd.f32 %v97_v31, %v96_v30 }
  0x22   :  { %112 = vadd.xlane.f32.xlu0 %v111_v32 }
  0xab   :  { %v113_v33 = vpop.xlane.xlu0 %112 }
  0xac   :  { %v114_v34 = vrot.slane %v113_v33, 4 }
  0xae   :  { %v115_v35 = vadd.f32 %v114_v34, %v113_v33 }
  0xb0   :  { %v116_v36 = vrot.slane %v115_v35, 2 }
  0xb2   :  { %v117_v37 = vadd.f32 %v116_v36, %v115_v35 }
  0xb4   :  { %v118_v38 = vrot.slane %v117_v37, 1 }
  0xb6   :  { %v119_v39 = vadd.f32 %v118_v38, %v117_v37 }
  0xb8   :  { %150 = vpush %v119_v39 }
  0xe9   :  { %s151_s0 = spop %150 }
  0xea   :  { %122 = sst [smem:[#allocation3]] %s151_s0 }
  0xeb   :  { %130 = dma.smem_to_hbm %s167_s1, 16, %s200_s2, [#allocation4]  }
  0xec   :  { %165 = dma.done.wait [#allocation4], 16  }
  0xed   :  { %166 = vsyncadd [#allocation4], 4294967280 }
  0xee   :  { %134 = sfence }
  0xef   :  { %135 = vsyncpa [#allocation4], 1 }

</bundles_post_ra>
